<compile_context>
chip_gen: v6e
topology: v6e:2x2x1
jax: 0.10.0
libtpu: 0.0.40
codegen_flags: <defaults>
</compile_context>

<pallas_src>
import functools

import jax
import jax.numpy as jnp
from jax.experimental import pallas as pl
from jax.experimental.pallas import tpu as pltpu


def _round_up(x: int, m: int) -> int:
    return (x + m - 1) // m * m


def _lowrank_kernel(u_ref, s_ref, vh_ref, out_ref):
    """out_tile = u_tile @ (diag(s) @ vh_tile).

    u_ref : (tm, R)  VMEM
    s_ref : (R, 1)   VMEM  (singular values)
    vh_ref: (R, tn)  VMEM
    out   : (tm, tn) VMEM
    """
    # Fold singular values into the (R, tn) vh tile: cheaper than scaling the
    # u tile (which is re-loaded for every j), and keeps the u operand on the
    # straight VMEM->MXU path.  No f32 upcast of MXU operands; accumulate f32.
    s = s_ref[...].astype(vh_ref.dtype)            # (R, 1)
    scaled_vh = vh_ref[...] * s                    # (R, tn), VPU sublane bcast
    acc = jnp.dot(u_ref[...], scaled_vh, preferred_element_type=jnp.float32)
    out_ref[...] = acc.astype(out_ref.dtype)


@functools.partial(jax.jit, static_argnames=("rank", "tm_max", "tn_max"))
def low_rank_forward(u, s, vh, *, rank: int, tm_max: int = 256, tn_max: int = 512):
    """Pallas implementation of LowRankParametrization.forward."""
    # Glue: rank slicing (small M*rank / rank*N copies, negligible).
    u_r = u[:, :rank]                # (M, R)
    s_r = s[:rank]                   # (R,)
    vh_r = vh[:rank, :]              # (R, N)

    M, R = u_r.shape
    _, N = vh_r.shape
    out_dtype = jnp.result_type(u.dtype, s.dtype, vh.dtype)

    # Tiny problems: custom-call + grid-step overhead dominates; let XLA fuse.
    if M * N < 64 * 256:
        return ((u_r * s_r[None, :]) @ vh_r).astype(out_dtype)

    # ---- Tile selection: lane-dense output tiles, contraction kept whole ----
    Mp = _round_up(M, 8)
    tm = Mp if Mp <= tm_max else tm_max
    Mp = _round_up(M, tm)

    Np = _round_up(N, 128)           # multiple of 128 -> unmasked vector stores
    tn = Np if Np <= tn_max else tn_max
    Np = _round_up(N, tn)

    # Zero-pad to tile multiples; zeros contribute nothing to the matmul.
    if Mp != M:
        u_r = jnp.pad(u_r, ((0, Mp - M), (0, 0)))
    if Np != N:
        vh_r = jnp.pad(vh_r, ((0, 0), (0, Np - N)))
    s_col = s_r.reshape(R, 1)        # broadcast over lanes of the vh tile

    itemsize = jnp.dtype(out_dtype).itemsize
    cost = pl.CostEstimate(
        flops=2 * Mp * Np * R,
        bytes_accessed=(Mp * R + R * Np + Mp * Np) * itemsize + R * itemsize,
        transcendentals=0,
    )

    out_padded = pl.pallas_call(
        _lowrank_kernel,
        out_shape=jax.ShapeDtypeStruct((Mp, Np), out_dtype),
        grid=(Mp // tm, Np // tn),
        in_specs=[
            pl.BlockSpec((tm, R), lambda i, j: (i, 0)),   # u tile: follows i
            pl.BlockSpec((R, 1), lambda i, j: (0, 0)),    # s: resident
            pl.BlockSpec((R, tn), lambda i, j: (0, j)),   # vh tile: follows j
        ],
        out_specs=pl.BlockSpec((tm, tn), lambda i, j: (i, j)),
        compiler_params=pltpu.CompilerParams(
            # Both axes independent -> shard across v7x's 2 TensorCores.
            dimension_semantics=("parallel", "parallel"),
        ),
        cost_estimate=cost,
    )(u_r, s_col, vh_r)

    if Mp != M or Np != N:
        out_padded = out_padded[:M, :N]
    return out_padded


if __name__ == "__main__":
    # Deterministic synthetic "SVD factors" (shapes consistent with
    # torch.linalg.svd of a (512, 768) weight, full_matrices=True).
    # Small enough to run instantly, large enough to exercise the 2x2 tiled
    # grid (tm=256, tn=512) including the N-padding path (768 -> 1024).
    M, N = 512, 768
    full_rank = min(M, N)
    rank = 32

    key = jax.random.PRNGKey(0)
    ku, ks, kv = jax.random.split(key, 3)
    u = jax.random.normal(ku, (M, M), dtype=jnp.float32)
    s = jnp.abs(jax.random.normal(ks, (full_rank,), dtype=jnp.float32)) + 0.1
    vh = jax.random.normal(kv, (N, N), dtype=jnp.float32)

    out = low_rank_forward(u, s, vh, rank=rank)
    jax.block_until_ready(out)

    # Reference check against plain JAX (same math as the PyTorch module).
    ref = u[:, :rank] @ jnp.diag(s[:rank]) @ vh[:rank, :]
    assert out.shape == (M, N), out.shape
    assert jnp.allclose(out, ref, atol=1e-3, rtol=1e-3), float(
        jnp.max(jnp.abs(out - ref))
    )

    print("KERNEL_OK")
</pallas_src>

<mosaic_0001>
module attributes {stable_mosaic.version = 11 : i64} {
  func.func @_lowrank_kernel(%arg0: i32, %arg1: i32, %arg2: memref<256x32xf32, #tpu.memory_space<vmem>>, %arg3: memref<32x1xf32, #tpu.memory_space<vmem>>, %arg4: memref<32x512xf32, #tpu.memory_space<vmem>>, %arg5: memref<256x512xf32, #tpu.memory_space<vmem>>) attributes {dimension_semantics = [#tpu.dimension_semantics<parallel>, #tpu.dimension_semantics<parallel>], iteration_bounds = array<i64: 2, 2>, scalar_prefetch = 0 : i64, scratch_operands = 0 : i64, tpu.core_type = #tpu.core_type<tc>, window_params = [{transform_indices = @transform_0, window_bounds = array<i64: 256, 32>}, {pipeline_mode = #tpu.pipeline_mode<synchronous>, transform_indices = @transform_1, window_bounds = array<i64: 32, 1>}, {transform_indices = @transform_2, window_bounds = array<i64: 32, 512>}, {transform_indices = @transform_3, window_bounds = array<i64: 256, 512>}]} {
    %c0 = arith.constant 0 : index
    %c0_0 = arith.constant 0 : index
    %0 = vector.load %arg3[%c0, %c0_0] : memref<32x1xf32, #tpu.memory_space<vmem>>, vector<32x1xf32>
    %c0_1 = arith.constant 0 : index
    %c0_2 = arith.constant 0 : index
    %1 = vector.load %arg4[%c0_1, %c0_2] : memref<32x512xf32, #tpu.memory_space<vmem>>, vector<32x512xf32>
    %2 = vector.broadcast %0 : vector<32x1xf32> to vector<32x512xf32>
    %3 = arith.mulf %1, %2 : vector<32x512xf32>
    %c0_3 = arith.constant 0 : index
    %c0_4 = arith.constant 0 : index
    %4 = vector.load %arg2[%c0_3, %c0_4] : memref<256x32xf32, #tpu.memory_space<vmem>>, vector<256x32xf32>
    %cst = arith.constant dense<0.000000e+00> : vector<256x512xf32>
    %5 = tpu.matmul %4, %3, %cst {dimension_numbers = #tpu.dot_dimension_numbers<[1], [0], [0], [1], [0, 0, 1, 1], [], []>} : vector<256x32xf32>, vector<32x512xf32>, vector<256x512xf32> -> vector<256x512xf32>
    %c0_5 = arith.constant 0 : index
    %c0_6 = arith.constant 0 : index
    %6 = vector.load %arg5[%c0_5, %c0_6] : memref<256x512xf32, #tpu.memory_space<vmem>>, vector<256x512xf32>
    tpu.vector_store %arg5[%c0_5, %c0_6], %5 {strides = array<i32>} : memref<256x512xf32, #tpu.memory_space<vmem>>, vector<256x512xf32>,
    return
  }
  func.func @transform_0(%arg0: i32, %arg1: i32) -> (i32, i32) {
    %c0_i32 = arith.constant 0 : i32
    %c0_i32_0 = arith.constant 0 : i32
    return %arg0, %c0_i32 : i32, i32
  }
  func.func @transform_1(%arg0: i32, %arg1: i32) -> (i32, i32) {
    %c0_i32 = arith.constant 0 : i32
    %c0_i32_0 = arith.constant 0 : i32
    %c0_i32_1 = arith.constant 0 : i32
    return %c0_i32, %c0_i32_0 : i32, i32
  }
  func.func @transform_2(%arg0: i32, %arg1: i32) -> (i32, i32) {
    %c0_i32 = arith.constant 0 : i32
    %c0_i32_0 = arith.constant 0 : i32
    return %c0_i32, %arg1 : i32, i32
  }
  func.func @transform_3(%arg0: i32, %arg1: i32) -> (i32, i32) {
    %c0_i32 = arith.constant 0 : i32
    return %arg0, %arg1 : i32, i32
  }
}

</mosaic_0001>

<bundles_post_ra>
// kernel: low_rank_forward.1
= control target key start
LH: loop header
LB: loop body
LE: loop exit
PB: predicated region body
PF: predicated region fallthrough
CT: control target
= control target key end

     0   :  { %s1703_s12 = smov 0   ;;  %s1705_s13 = smov 0   ;;  %s2426_s0 = inlined_call_operand.vmem [shape: f32[512,32], index: 0, kind: input, shape index: {}]   ;;  %s2427_s1 = inlined_call_operand.vmem [shape: f32[32,1], index: 1, kind: input, shape index: {}]   ;;  %s2428_s2 = inlined_call_operand.vmem [shape: f32[32,1024], index: 2, kind: input, shape index: {}]   ;;  %s2429_s3 = inlined_call_operand.vmem [shape: f32[512,1024], index: 3, kind: output, shape index: {}]  }
   0x1   :  { %s1707_s14 = smov 0   ;;  %s1709_s15 = smov 0  }
   0x2   :  { %s1711_s16 = smov 0   ;;  %s1713_s17 = smov 0  }
   0x3   :  { %s1715_s18 = smov 0   ;;  %s1717_s19 = smov 0  }
   0x4   :  { %s1719_s20 = smov 0  }
   0x5 LB: > { %s1448_s21 = sadd.s32 4294967295, %s1679_s20   ;;  %s22_s22 = sadd.s32 1, %s1671_s18  ;;  %s1679_s20 = sphi %s1719_s20, %s13_s20   ;;  %s1675_s19 = sphi %s1717_s19, %s2438_s19   ;;  %s1671_s18 = sphi %s1715_s18, %s2437_s18   ;;  %s1667_s17 = sphi %s1713_s17, %s2436_s17   ;;  %s1663_s16 = sphi %s1711_s16, %s2435_s16   ;;  %s1659_s15 = sphi %s1709_s15, %s2434_s15   ;;  %s1655_s14 = sphi %s1707_s14, %s2433_s14   ;;  %s1651_s13 = sphi %s1705_s13, %s2432_s13   ;;  %s1647_s12 = sphi %s1703_s12, %s2431_s12  }
   0x6   : > { %p23_p0 = scmp.ge.s32.totalorder %s22_s22, 2  ;;  %s25_s23 = sadd.s32 1, %s1675_s19 }
   0x7   : > { %s79_s24 = sadd.s32 1, %s1659_s15  ;;  %p86_p1 = scmp.ne.s32.totalorder %s1659_s15, %s1655_s14 }
   0x8   : > { %s2440_s22 = smov (%p23_p0, %s22_s22), 0  ;;  %s2442_s23 = smov (!%p23_p0, %s25_s23), %s1675_s19 }
   0x9   : > { %s76_s25 = ssub.s32 %s1671_s18, %s2440_s22  ;;  %p87_p2 = scmp.eq.s32.totalorder %s1679_s20, 0 }
   0xa   : > { %p27_p3 = scmp.ge.s32.totalorder %s2442_s23, 2  ;;  %p77_p4 = scmp.eq.s32.totalorder %s76_s25, 0 }
   0xb   : > { %p88_p5 = por %p87_p2, %p86_p1  ;;  %s107_s26 = sadd.s32 1, %s1651_s13 }
   0xc   : > { %s2444_s23 = smov (%p27_p3, %s2442_s23), 0  ;;  %p117_p6 = scmp.ne.s32.totalorder %s1651_s13, %s1647_s12 }
   0xd   : > { %s1764_s27 = scalar_select %p77_p4, %s1659_s15, %s79_s24  }
   0xe   : > { %s102_s28 = ssub.s32 %s1675_s19, %s2444_s23  ;;  %p118_p7 = scmp.eq.s32.totalorder %s1448_s21, 3 }
   0xf   : > { %s104_s29 = sor.u32 %s102_s28, %s76_s25  ;;  %p1451_p10 = scmp.ge.s32.totalorder %s1679_s20, 4 }
  0x10   : > { %p105_p8 = scmp.eq.s32.totalorder %s104_s29, 0  ;;  %p1770_p9 = por %p118_p7, %p117_p6 }
  0x11   : > { %143 = sbr.rel (%p1451_p10) target bundleno = 34 (0x22), region = 20 }
  0x12   : > { %s1775_s4 = scalar_select %p105_p8, %s1651_s13, %s107_s26  }
  0x16   : > { %155 = sbr.rel (!%p88_p5) target bundleno = 34 (0x22), region = 28  ;;  %s157_s5 = sand.u32 (%p88_p5), 1, %s1659_s15  }
  0x17   : > { %s1531_s6 = sshll.u32 (%p88_p5), %s1671_s18, 5  ;;  %s1452_s7 = sshll.u32 (%p88_p5), %s157_s5, 7 }
  0x18   : > { %s1783_s10 = scalar_lea.vmem (%p88_p5), %s2428_s2, %s1531_s6  ;;  %s159_s11 = scalar_lea.vmem (%p88_p5), [#allocation2], %s1452_s7 }
  0x19   : > { %v175_v0 = vld [vmem:[%s1783_s10] sm:$0xff] (%p88_p5)  ;;  %v177_v1 = vld [vmem:[%s1783_s10 + $0x8] sm:$0xff] (%p88_p5)  ;;  %v179_v2 = vld [vmem:[%s1783_s10 + $0x10] sm:$0xff] (%p88_p5) }
  0x1a   : > { %176 = vst [vmem:[%s159_s11] sm:$0xff] (%p88_p5), %v175_v0  ;;  %178 = vst [vmem:[%s159_s11 + $0x8] sm:$0xff] (%p88_p5), %v177_v1  ;;  %v181_v3 = vld [vmem:[%s1783_s10 + $0x18] sm:$0xff] (%p88_p5)  ;;  %v183_v4 = vld [vmem:[%s1783_s10 + $0x40] sm:$0xff] (%p88_p5) }
  0x1b   : > { %180 = vst [vmem:[%s159_s11 + $0x10] sm:$0xff] %v179_v2  ;;  %v185_v5 = vld [vmem:[%s1783_s10 + $0x48] sm:$0xff]  ;;  %182 = vst [vmem:[%s159_s11 + $0x18] sm:$0xff] %v181_v3  ;;  %v187_v6 = vld [vmem:[%s1783_s10 + $0x50] sm:$0xff] }
  0x1c   : > { %184 = vst [vmem:[%s159_s11 + $0x20] sm:$0xff] %v183_v4  ;;  %186 = vst [vmem:[%s159_s11 + $0x28] sm:$0xff] %v185_v5  ;;  %v189_v7 = vld [vmem:[%s1783_s10 + $0x58] sm:$0xff]  ;;  %v191_v8 = vld [vmem:[%s1783_s10 + $0x80] sm:$0xff] }
  0x1d   : > { %188 = vst [vmem:[%s159_s11 + $0x30] sm:$0xff] %v187_v6  ;;  %190 = vst [vmem:[%s159_s11 + $0x38] sm:$0xff] %v189_v7  ;;  %v193_v9 = vld [vmem:[%s1783_s10 + $0x88] sm:$0xff]  ;;  %v195_v10 = vld [vmem:[%s1783_s10 + $0x90] sm:$0xff] }
  0x1e   : > { %192 = vst [vmem:[%s159_s11 + $0x40] sm:$0xff] %v191_v8  ;;  %v197_v11 = vld [vmem:[%s1783_s10 + $0x98] sm:$0xff]  ;;  %194 = vst [vmem:[%s159_s11 + $0x48] sm:$0xff] %v193_v9  ;;  %v199_v12 = vld [vmem:[%s1783_s10 + $0xc0] sm:$0xff] }
  0x1f   : > { %196 = vst [vmem:[%s159_s11 + $0x50] sm:$0xff] %v195_v10  ;;  %198 = vst [vmem:[%s159_s11 + $0x58] sm:$0xff] %v197_v11  ;;  %v201_v13 = vld [vmem:[%s1783_s10 + $0xc8] sm:$0xff]  ;;  %v203_v14 = vld [vmem:[%s1783_s10 + $0xd0] sm:$0xff] }
  0x20   : > { %200 = vst [vmem:[%s159_s11 + $0x60] sm:$0xff] %v199_v12  ;;  %202 = vst [vmem:[%s159_s11 + $0x68] sm:$0xff] %v201_v13  ;;  %v205_v15 = vld [vmem:[%s1783_s10 + $0xd8] sm:$0xff] }
  0x21   : > { %204 = vst [vmem:[%s159_s11 + $0x70] sm:$0xff] %v203_v14  ;;  %206 = vst [vmem:[%s159_s11 + $0x78] sm:$0xff] %v205_v15 }
  0x22 PF: > { %p1455_p11 = scmp.ge.s32.totalorder %s1679_s20, 1  ;;  %p211_p12 = scmp.lt.s32.totalorder %s1679_s20, 5 }
  0x24   : > { %p212_p13 = pnand %p1455_p11, %p211_p12 }
  0x25   : > { %s218_s7 = sand.u32 (!%p212_p13), 1, %s1655_s14   ;;  %s1458_s9 = sshll.u32 (!%p212_p13), %s1667_s17, 5 }
  0x26   : > { %215 = sbr.rel (%p212_p13) target bundleno = 534 (0x216), region = 51  ;;  %s1456_s8 = sshll.u32 (!%p212_p13), %s218_s7, 7 }
  0x27   : > { %p246_p0 = scmp.lt.s32.totalorder (!%p212_p13), %s1458_s9, 63  ;;  %s1819_s10 = scalar_lea.vmem (!%p212_p13), [#allocation2], %s1456_s8 }
  0x28   : > { %s242_s25 = sand.u32 (!%p212_p13), 1, %s1647_s12  }
  0x29   : > { %s1457_s26 = sshll.u32 (!%p212_p13), %s242_s25, 10 }
  0x2a   : > { %s2004_s28 = scalar_lea.vmem (!%p212_p13), [#allocation3], %s1457_s26 }
  0x2b   : > { %v257_v16 = vld [vmem:[%s2427_s1 + $0x18] sm:$0xff]  ;;  %v255_v17 = vld [vmem:[%s2427_s1 + $0x8] sm:$0xff]  ;;  %v1681_v18 = vmov 0   ;;  %v256_v19 = vld [vmem:[%s2427_s1 + $0x10] sm:$0xff]  ;;  %v1682_v21 = vmov 0.0   ;;  %s2446_s9 = smov (!%p246_p0, %s1458_s9), 63 }
  0x2c   : > { %1608 = vset.pattern.permute.xlu1 %v1681_v18  ;;  %1607 = vset.pattern.permute.xlu0 %v1681_v18  ;;  %v254_v20 = vld [vmem:[%s2427_s1] sm:$0xff]  ;;  %v271_v22 = vld [vmem:[%s1819_s10 + $0x68] sm:$0xff]  ;;  %v273_v23 = vld [vmem:[%s1819_s10 + $0x78] sm:$0xff]  ;;  %s1459_s14 = sshll.u32 %s2446_s9, 3  ;;  %vm342_vm0 = vcmask 261120   ;;  %s1526_s12 = sshll.u32 (%p1770_p9), %s1663_s16, 2 }
  0x2d   : > { %291 = vperm.xlu0 %1607, %v257_v16   ;;  %281 = vperm.xlu1 %1608, %v255_v17   ;;  %v270_v24 = vld [vmem:[%s1819_s10 + $0x60] sm:$0xff]  ;;  %v272_v25 = vld [vmem:[%s1819_s10 + $0x70] sm:$0xff]  ;;  %v267_v33 = vld [vmem:[%s1819_s10 + $0x48] sm:$0xff]  ;;  %s1843_s24 = scalar_lea.vmem %s2426_s0, %s1459_s14  ;;  %s1532_s29 = sshll.u32 (%p1770_p9), %s1667_s17, 8 }
  0x2e   : > { %503 = vmatprep.mubr.f32.mxu0 %v1682_v21  ;;  %760 = vmatprep.mubr.f32.mxu1 %v1682_v21  ;;  %v266_v30 = vld [vmem:[%s1819_s10 + $0x40] sm:$0xff]  ;;  %v268_v34 = vld [vmem:[%s1819_s10 + $0x50] sm:$0xff]  ;;  %v269_v35 = vld [vmem:[%s1819_s10 + $0x58] sm:$0xff]  ;;  %s1091_s30 = sadd.s32 (%p1770_p9), %s1532_s29, %s1526_s12 }
  0x2f   : > { %v263_v37 = vld [vmem:[%s1819_s10 + $0x28] sm:$0xff]  ;;  %v265_v38 = vld [vmem:[%s1819_s10 + $0x38] sm:$0xff]  ;;  %v262_v43 = vld [vmem:[%s1819_s10 + $0x20] sm:$0xff]  ;;  %s1528_s5 = sshll.u32 (%p1770_p9), %s1091_s30, 3 }
  0x30   : > { %v264_v44 = vld [vmem:[%s1819_s10 + $0x30] sm:$0xff]  ;;  %v259_v46 = vld [vmem:[%s1819_s10 + $0x8] sm:$0xff]  ;;  %v261_v47 = vld [vmem:[%s1819_s10 + $0x18] sm:$0xff]  ;;  %s2150_s8 = scalar_lea.vmem (%p1770_p9), %s2429_s3, %s1528_s5 }
  0x31   : > { %286 = vperm.xlu0 %1607, %v256_v19   ;;  %276 = vperm.xlu1 %1608, %v254_v20   ;;  %v258_v48 = vld [vmem:[%s1819_s10] sm:$0xff]  ;;  %v260_v49 = vld [vmem:[%s1819_s10 + $0x10] sm:$0xff]  ;;  %v311_v59 = vld [vmem:[%s1843_s24 + $0x8] sm:$0xff] }
  0x32   : > { %v310_v58 = vld [vmem:[%s1843_s24] sm:$0xff]  ;;  %v312_v60 = vld [vmem:[%s1843_s24 + $0x10] sm:$0xff]  ;;  %v313_v61 = vld [vmem:[%s1843_s24 + $0x18] sm:$0xff] }
  0x33   : > { %v314_v62 = vld [vmem:[%s1843_s24 + $0x20] sm:$0xff]  ;;  %v315_v63 = vld [vmem:[%s1843_s24 + $0x28] sm:$0xff]  ;;  %v316_v0 = vld [vmem:[%s1843_s24 + $0x30] sm:$0xff] }
  0x34   : > { %v317_v1 = vld [vmem:[%s1843_s24 + $0x38] sm:$0xff]  ;;  %v318_v2 = vld [vmem:[%s1843_s24 + $0x40] sm:$0xff]  ;;  %v319_v3 = vld [vmem:[%s1843_s24 + $0x48] sm:$0xff] }
  0x35   : > { %v320_v4 = vld [vmem:[%s1843_s24 + $0x50] sm:$0xff]  ;;  %v321_v5 = vld [vmem:[%s1843_s24 + $0x58] sm:$0xff]  ;;  %v322_v6 = vld [vmem:[%s1843_s24 + $0x60] sm:$0xff] }
  0x36   : > { %v323_v7 = vld [vmem:[%s1843_s24 + $0x68] sm:$0xff]  ;;  %v324_v8 = vld [vmem:[%s1843_s24 + $0x70] sm:$0xff]  ;;  %v325_v9 = vld [vmem:[%s1843_s24 + $0x78] sm:$0xff] }
  0x37   : > { %v326_v10 = vld [vmem:[%s1843_s24 + $0x80] sm:$0xff]  ;;  %v327_v11 = vld [vmem:[%s1843_s24 + $0x88] sm:$0xff]  ;;  %v328_v12 = vld [vmem:[%s1843_s24 + $0x90] sm:$0xff] }
  0x38   : > { %v329_v13 = vld [vmem:[%s1843_s24 + $0x98] sm:$0xff]  ;;  %v330_v14 = vld [vmem:[%s1843_s24 + $0xa0] sm:$0xff]  ;;  %v331_v15 = vld [vmem:[%s1843_s24 + $0xa8] sm:$0xff] }
  0x39   : > { %v332_v16 = vld [vmem:[%s1843_s24 + $0xb0] sm:$0xff]  ;;  %v333_v17 = vld [vmem:[%s1843_s24 + $0xb8] sm:$0xff]  ;;  %v334_v18 = vld [vmem:[%s1843_s24 + $0xc0] sm:$0xff] }
  0x3a   : > { %v335_v19 = vld [vmem:[%s1843_s24 + $0xc8] sm:$0xff]  ;;  %v336_v20 = vld [vmem:[%s1843_s24 + $0xd0] sm:$0xff] }
  0xa8   : > { %v292_v26 = vpop.permute.xlu0 %291  ;;  %v282_v27 = vpop.permute.xlu1 %281 }
  0xa9   : > { %v307_v28 = vmul.f32 %v292_v26, %v271_v22  ;;  %v309_v29 = vmul.f32 %v292_v26, %v273_v23  ;;  %v306_v31 = vmul.f32 %v292_v26, %v270_v24  ;;  %v308_v32 = vmul.f32 %v292_v26, %v272_v25  ;;  %v337_v22 = vld [vmem:[%s1843_s24 + $0xd8] sm:$0xff]  ;;  %v338_v23 = vld [vmem:[%s1843_s24 + $0xe0] sm:$0xff]  ;;  %v339_v24 = vld [vmem:[%s1843_s24 + $0xe8] sm:$0xff] }
  0xaa   : > { %v299_v50 = vmul.f32 %v282_v27, %v263_v37  ;;  %v301_v51 = vmul.f32 %v282_v27, %v265_v38  ;;  %v298_v52 = vmul.f32 %v282_v27, %v262_v43  ;;  %v300_v53 = vmul.f32 %v282_v27, %v264_v44  ;;  %v340_v25 = vld [vmem:[%s1843_s24 + $0xf0] sm:$0xff]  ;;  %v341_v26 = vld [vmem:[%s1843_s24 + $0xf8] sm:$0xff] }
  0xab   : > { %463 = vmatprep.subr.mxu0 %v307_v28  ;;  %720 = vmatprep.subr.mxu1 %v309_v29 }
  0xac   : > { %v287_v36 = vpop.permute.xlu0 %286  ;;  %464 = vmatpush1.msra.mxu0 %v306_v31  ;;  %721 = vmatpush1.msra.mxu1 %v308_v32  ;;  %v277_v45 = vpop.permute.xlu1 %276 }
  0xad   : > { %v302_v39 = vmul.f32 %v287_v36, %v266_v30  ;;  %v303_v40 = vmul.f32 %v287_v36, %v267_v33  ;;  %v304_v41 = vmul.f32 %v287_v36, %v268_v34  ;;  %v305_v42 = vmul.f32 %v287_v36, %v269_v35 }
  0xae   : > { %v295_v54 = vmul.f32 %v277_v45, %v259_v46  ;;  %v297_v55 = vmul.f32 %v277_v45, %v261_v47  ;;  %v294_v56 = vmul.f32 %v277_v45, %v258_v48  ;;  %v296_v57 = vmul.f32 %v277_v45, %v260_v49 }
  0xaf   : > { %465 = vmatprep.subr.mxu0 %v303_v40  ;;  %722 = vmatprep.subr.mxu1 %v305_v42 }
  0xb0   : > { %466 = vmatpush1.msra.mxu0 %v302_v39  ;;  %723 = vmatpush1.msra.mxu1 %v304_v41 }
  0xb1   : > { %467 = vmatprep.subr.mxu0 %v299_v50  ;;  %724 = vmatprep.subr.mxu1 %v301_v51 }
  0xb2   : > { %468 = vmatpush1.msra.mxu0 %v298_v52  ;;  %725 = vmatpush1.msra.mxu1 %v300_v53 }
  0xb3   : > { %469 = vmatprep.subr.mxu0 %v295_v54  ;;  %726 = vmatprep.subr.mxu1 %v297_v55 }
  0xb4   : > { %470 = vmatpush1.msra.mxu0 %v294_v56  ;;  %727 = vmatpush1.msra.mxu1 %v296_v57 }
  0xb5   : > { %1460 = vmatmul.mubr.msk.f32.vlgmr.msra.gmra.mxu0 %vm342_vm0, %v310_v58  ;;  %1492 = vmatmul.mubr.msk.f32.vlgmr.msra.gmra.mxu1 %vm342_vm0, %v310_v58 }
  0xb6   : > { %509 = vmatprep.mubr.f32.mxu0 %v1682_v21  ;;  %766 = vmatprep.mubr.f32.mxu1 %v1682_v21 }
  0xb9   : > { %1461 = vmatmul.mubr.msk.f32.gmra.mxu0 %vm342_vm0, %v311_v59  ;;  %1493 = vmatmul.mubr.msk.f32.gmra.mxu1 %vm342_vm0, %v311_v59 }
  0xba   : > { %515 = vmatprep.mubr.f32.mxu0 %v1682_v21  ;;  %772 = vmatprep.mubr.f32.mxu1 %v1682_v21 }
  0xbd   : > { %1462 = vmatmul.mubr.msk.f32.gmra.mxu0 %vm342_vm0, %v312_v60  ;;  %1494 = vmatmul.mubr.msk.f32.gmra.mxu1 %vm342_vm0, %v312_v60 }
  0xbe   : > { %521 = vmatprep.mubr.f32.mxu0 %v1682_v21  ;;  %778 = vmatprep.mubr.f32.mxu1 %v1682_v21 }
  0xc1   : > { %1463 = vmatmul.mubr.msk.f32.gmra.mxu0 %vm342_vm0, %v313_v61  ;;  %1495 = vmatmul.mubr.msk.f32.gmra.mxu1 %vm342_vm0, %v313_v61 }
  0xc2   : > { %527 = vmatprep.mubr.f32.mxu0 %v1682_v21  ;;  %784 = vmatprep.mubr.f32.mxu1 %v1682_v21 }
  0xc5   : > { %1464 = vmatmul.mubr.msk.f32.gmra.mxu0 %vm342_vm0, %v314_v62  ;;  %1496 = vmatmul.mubr.msk.f32.gmra.mxu1 %vm342_vm0, %v314_v62 }
  0xc6   : > { %533 = vmatprep.mubr.f32.mxu0 %v1682_v21  ;;  %790 = vmatprep.mubr.f32.mxu1 %v1682_v21 }
  0xc9   : > { %1465 = vmatmul.mubr.msk.f32.gmra.mxu0 %vm342_vm0, %v315_v63  ;;  %1497 = vmatmul.mubr.msk.f32.gmra.mxu1 %vm342_vm0, %v315_v63 }
  0xca   : > { %539 = vmatprep.mubr.f32.mxu0 %v1682_v21  ;;  %796 = vmatprep.mubr.f32.mxu1 %v1682_v21 }
  0xcd   : > { %1466 = vmatmul.mubr.msk.f32.gmra.mxu0 %vm342_vm0, %v316_v0  ;;  %1498 = vmatmul.mubr.msk.f32.gmra.mxu1 %vm342_vm0, %v316_v0 }
  0xce   : > { %545 = vmatprep.mubr.f32.mxu0 %v1682_v21  ;;  %802 = vmatprep.mubr.f32.mxu1 %v1682_v21 }
  0xd1   : > { %1467 = vmatmul.mubr.msk.f32.gmra.mxu0 %vm342_vm0, %v317_v1  ;;  %1499 = vmatmul.mubr.msk.f32.gmra.mxu1 %vm342_vm0, %v317_v1 }
  0xd2   : > { %551 = vmatprep.mubr.f32.mxu0 %v1682_v21  ;;  %808 = vmatprep.mubr.f32.mxu1 %v1682_v21 }
  0xd5   : > { %1468 = vmatmul.mubr.msk.f32.gmra.mxu0 %vm342_vm0, %v318_v2  ;;  %1500 = vmatmul.mubr.msk.f32.gmra.mxu1 %vm342_vm0, %v318_v2 }
  0xd6   : > { %557 = vmatprep.mubr.f32.mxu0 %v1682_v21  ;;  %814 = vmatprep.mubr.f32.mxu1 %v1682_v21 }
  0xd9   : > { %1469 = vmatmul.mubr.msk.f32.gmra.mxu0 %vm342_vm0, %v319_v3  ;;  %1501 = vmatmul.mubr.msk.f32.gmra.mxu1 %vm342_vm0, %v319_v3 }
  0xda   : > { %563 = vmatprep.mubr.f32.mxu0 %v1682_v21  ;;  %820 = vmatprep.mubr.f32.mxu1 %v1682_v21 }
  0xdd   : > { %1470 = vmatmul.mubr.msk.f32.gmra.mxu0 %vm342_vm0, %v320_v4  ;;  %1502 = vmatmul.mubr.msk.f32.gmra.mxu1 %vm342_vm0, %v320_v4 }
  0xde   : > { %569 = vmatprep.mubr.f32.mxu0 %v1682_v21  ;;  %826 = vmatprep.mubr.f32.mxu1 %v1682_v21 }
  0xe1   : > { %1471 = vmatmul.mubr.msk.f32.gmra.mxu0 %vm342_vm0, %v321_v5  ;;  %1503 = vmatmul.mubr.msk.f32.gmra.mxu1 %vm342_vm0, %v321_v5 }
  0xe2   : > { %575 = vmatprep.mubr.f32.mxu0 %v1682_v21  ;;  %832 = vmatprep.mubr.f32.mxu1 %v1682_v21 }
  0xe5   : > { %1472 = vmatmul.mubr.msk.f32.gmra.mxu0 %vm342_vm0, %v322_v6  ;;  %1504 = vmatmul.mubr.msk.f32.gmra.mxu1 %vm342_vm0, %v322_v6 }
  0xe6   : > { %581 = vmatprep.mubr.f32.mxu0 %v1682_v21  ;;  %838 = vmatprep.mubr.f32.mxu1 %v1682_v21 }
  0xe9   : > { %1473 = vmatmul.mubr.msk.f32.gmra.mxu0 %vm342_vm0, %v323_v7  ;;  %1505 = vmatmul.mubr.msk.f32.gmra.mxu1 %vm342_vm0, %v323_v7 }
  0xea   : > { %587 = vmatprep.mubr.f32.mxu0 %v1682_v21  ;;  %844 = vmatprep.mubr.f32.mxu1 %v1682_v21 }
  0xed   : > { %1474 = vmatmul.mubr.msk.f32.gmra.mxu0 %vm342_vm0, %v324_v8  ;;  %1506 = vmatmul.mubr.msk.f32.gmra.mxu1 %vm342_vm0, %v324_v8 }
  0xee   : > { %593 = vmatprep.mubr.f32.mxu0 %v1682_v21  ;;  %850 = vmatprep.mubr.f32.mxu1 %v1682_v21 }
  0xf1   : > { %1475 = vmatmul.mubr.msk.f32.gmra.mxu0 %vm342_vm0, %v325_v9  ;;  %1507 = vmatmul.mubr.msk.f32.gmra.mxu1 %vm342_vm0, %v325_v9 }
  0xf2   : > { %599 = vmatprep.mubr.f32.mxu0 %v1682_v21  ;;  %856 = vmatprep.mubr.f32.mxu1 %v1682_v21 }
  0xf5   : > { %1476 = vmatmul.mubr.msk.f32.gmra.mxu0 %vm342_vm0, %v326_v10  ;;  %1508 = vmatmul.mubr.msk.f32.gmra.mxu1 %vm342_vm0, %v326_v10 }
  0xf6   : > { %605 = vmatprep.mubr.f32.mxu0 %v1682_v21  ;;  %862 = vmatprep.mubr.f32.mxu1 %v1682_v21 }
  0xf9   : > { %1477 = vmatmul.mubr.msk.f32.gmra.mxu0 %vm342_vm0, %v327_v11  ;;  %1509 = vmatmul.mubr.msk.f32.gmra.mxu1 %vm342_vm0, %v327_v11 }
  0xfa   : > { %611 = vmatprep.mubr.f32.mxu0 %v1682_v21  ;;  %868 = vmatprep.mubr.f32.mxu1 %v1682_v21 }
  0xfd   : > { %1478 = vmatmul.mubr.msk.f32.gmra.mxu0 %vm342_vm0, %v328_v12  ;;  %1510 = vmatmul.mubr.msk.f32.gmra.mxu1 %vm342_vm0, %v328_v12 }
  0xfe   : > { %617 = vmatprep.mubr.f32.mxu0 %v1682_v21  ;;  %874 = vmatprep.mubr.f32.mxu1 %v1682_v21 }
 0x101   : > { %1479 = vmatmul.mubr.msk.f32.gmra.mxu0 %vm342_vm0, %v329_v13  ;;  %1511 = vmatmul.mubr.msk.f32.gmra.mxu1 %vm342_vm0, %v329_v13 }
 0x102   : > { %623 = vmatprep.mubr.f32.mxu0 %v1682_v21  ;;  %880 = vmatprep.mubr.f32.mxu1 %v1682_v21 }
 0x105   : > { %1480 = vmatmul.mubr.msk.f32.gmra.mxu0 %vm342_vm0, %v330_v14  ;;  %1512 = vmatmul.mubr.msk.f32.gmra.mxu1 %vm342_vm0, %v330_v14 }
 0x106   : > { %629 = vmatprep.mubr.f32.mxu0 %v1682_v21  ;;  %886 = vmatprep.mubr.f32.mxu1 %v1682_v21 }
 0x109   : > { %1481 = vmatmul.mubr.msk.f32.gmra.mxu0 %vm342_vm0, %v331_v15  ;;  %1513 = vmatmul.mubr.msk.f32.gmra.mxu1 %vm342_vm0, %v331_v15 }
 0x10a   : > { %635 = vmatprep.mubr.f32.mxu0 %v1682_v21  ;;  %892 = vmatprep.mubr.f32.mxu1 %v1682_v21 }
 0x10d   : > { %1482 = vmatmul.mubr.msk.f32.gmra.mxu0 %vm342_vm0, %v332_v16  ;;  %1514 = vmatmul.mubr.msk.f32.gmra.mxu1 %vm342_vm0, %v332_v16 }
 0x10e   : > { %641 = vmatprep.mubr.f32.mxu0 %v1682_v21  ;;  %898 = vmatprep.mubr.f32.mxu1 %v1682_v21 }
 0x111   : > { %1483 = vmatmul.mubr.msk.f32.gmra.mxu0 %vm342_vm0, %v333_v17  ;;  %1515 = vmatmul.mubr.msk.f32.gmra.mxu1 %vm342_vm0, %v333_v17 }
 0x112   : > { %647 = vmatprep.mubr.f32.mxu0 %v1682_v21  ;;  %904 = vmatprep.mubr.f32.mxu1 %v1682_v21 }
 0x115   : > { %1484 = vmatmul.mubr.msk.f32.gmra.mxu0 %vm342_vm0, %v334_v18  ;;  %1516 = vmatmul.mubr.msk.f32.gmra.mxu1 %vm342_vm0, %v334_v18 }
 0x116   : > { %653 = vmatprep.mubr.f32.mxu0 %v1682_v21  ;;  %910 = vmatprep.mubr.f32.mxu1 %v1682_v21 }
 0x119   : > { %1485 = vmatmul.mubr.msk.f32.gmra.mxu0 %vm342_vm0, %v335_v19  ;;  %1517 = vmatmul.mubr.msk.f32.gmra.mxu1 %vm342_vm0, %v335_v19 }
 0x11a   : > { %659 = vmatprep.mubr.f32.mxu0 %v1682_v21  ;;  %916 = vmatprep.mubr.f32.mxu1 %v1682_v21 }
 0x11d   : > { %1486 = vmatmul.mubr.msk.f32.gmra.mxu0 %vm342_vm0, %v336_v20  ;;  %1518 = vmatmul.mubr.msk.f32.gmra.mxu1 %vm342_vm0, %v336_v20 }
 0x11e   : > { %665 = vmatprep.mubr.f32.mxu0 %v1682_v21  ;;  %922 = vmatprep.mubr.f32.mxu1 %v1682_v21 }
 0x121   : > { %1487 = vmatmul.mubr.msk.f32.gmra.mxu0 %vm342_vm0, %v337_v22  ;;  %1519 = vmatmul.mubr.msk.f32.gmra.mxu1 %vm342_vm0, %v337_v22 }
 0x122   : > { %671 = vmatprep.mubr.f32.mxu0 %v1682_v21  ;;  %928 = vmatprep.mubr.f32.mxu1 %v1682_v21 }
 0x125   : > { %1488 = vmatmul.mubr.msk.f32.gmra.mxu0 %vm342_vm0, %v338_v23  ;;  %1520 = vmatmul.mubr.msk.f32.gmra.mxu1 %vm342_vm0, %v338_v23 }
 0x126   : > { %677 = vmatprep.mubr.f32.mxu0 %v1682_v21  ;;  %934 = vmatprep.mubr.f32.mxu1 %v1682_v21 }
 0x129   : > { %1489 = vmatmul.mubr.msk.f32.gmra.mxu0 %vm342_vm0, %v339_v24  ;;  %1521 = vmatmul.mubr.msk.f32.gmra.mxu1 %vm342_vm0, %v339_v24 }
 0x12a   : > { %683 = vmatprep.mubr.f32.mxu0 %v1682_v21  ;;  %940 = vmatprep.mubr.f32.mxu1 %v1682_v21 }
 0x12d   : > { %1490 = vmatmul.mubr.msk.f32.gmra.mxu0 %vm342_vm0, %v340_v25  ;;  %1522 = vmatmul.mubr.msk.f32.gmra.mxu1 %vm342_vm0, %v340_v25 }
 0x12e   : > { %689 = vmatprep.mubr.f32.mxu0 %v1682_v21  ;;  %946 = vmatprep.mubr.f32.mxu1 %v1682_v21 }
 0x131   : > { %1491 = vmatmul.mubr.msk.f32.gmra.mxu0 %vm342_vm0, %v341_v26  ;;  %1523 = vmatmul.mubr.msk.f32.gmra.mxu1 %vm342_vm0, %v341_v26 }
 0x175   : > { %v505_v27 = vpop.f32.mrf.mxu0  ;;  %v762_v28 = vpop.f32.mrf.mxu1 }
 0x176   : > { %953 = vst [vmem:[%s2004_s28] sm:$0xff] %v505_v27  ;;  %955 = vst [vmem:[%s2004_s28 + $0x10] sm:$0xff] %v762_v28 }
 0x177   : > { %v507_v21 = vpop.f32.mrf.mxu0  ;;  %v764_v29 = vpop.f32.mrf.mxu1 }
 0x178   : > { %954 = vst [vmem:[%s2004_s28 + $0x8] sm:$0xff] %v507_v21  ;;  %956 = vst [vmem:[%s2004_s28 + $0x18] sm:$0xff] %v764_v29 }
 0x179   : > { %v511_v30 = vpop.f32.mrf.mxu0  ;;  %v768_v31 = vpop.f32.mrf.mxu1 }
 0x17a   : > { %957 = vst [vmem:[%s2004_s28 + $0x20] sm:$0xff] %v511_v30  ;;  %959 = vst [vmem:[%s2004_s28 + $0x30] sm:$0xff] %v768_v31 }
 0x17b   : > { %v513_v32 = vpop.f32.mrf.mxu0  ;;  %v770_v33 = vpop.f32.mrf.mxu1 }
 0x17c   : > { %958 = vst [vmem:[%s2004_s28 + $0x28] sm:$0xff] %v513_v32  ;;  %960 = vst [vmem:[%s2004_s28 + $0x38] sm:$0xff] %v770_v33 }
 0x17d   : > { %v517_v34 = vpop.f32.mrf.mxu0  ;;  %v774_v35 = vpop.f32.mrf.mxu1 }
 0x17e   : > { %961 = vst [vmem:[%s2004_s28 + $0x40] sm:$0xff] %v517_v34  ;;  %963 = vst [vmem:[%s2004_s28 + $0x50] sm:$0xff] %v774_v35 }
 0x17f   : > { %v519_v36 = vpop.f32.mrf.mxu0  ;;  %v776_v37 = vpop.f32.mrf.mxu1 }
 0x180   : > { %962 = vst [vmem:[%s2004_s28 + $0x48] sm:$0xff] %v519_v36  ;;  %964 = vst [vmem:[%s2004_s28 + $0x58] sm:$0xff] %v776_v37 }
 0x181   : > { %v523_v38 = vpop.f32.mrf.mxu0  ;;  %v780_v39 = vpop.f32.mrf.mxu1 }
 0x182   : > { %965 = vst [vmem:[%s2004_s28 + $0x60] sm:$0xff] %v523_v38  ;;  %967 = vst [vmem:[%s2004_s28 + $0x70] sm:$0xff] %v780_v39 }
 0x183   : > { %v525_v40 = vpop.f32.mrf.mxu0  ;;  %v782_v41 = vpop.f32.mrf.mxu1 }
 0x184   : > { %966 = vst [vmem:[%s2004_s28 + $0x68] sm:$0xff] %v525_v40  ;;  %968 = vst [vmem:[%s2004_s28 + $0x78] sm:$0xff] %v782_v41 }
 0x185   : > { %v529_v42 = vpop.f32.mrf.mxu0  ;;  %v786_v43 = vpop.f32.mrf.mxu1 }
 0x186   : > { %969 = vst [vmem:[%s2004_s28 + $0x80] sm:$0xff] %v529_v42  ;;  %971 = vst [vmem:[%s2004_s28 + $0x90] sm:$0xff] %v786_v43 }
 0x187   : > { %v531_v44 = vpop.f32.mrf.mxu0  ;;  %v788_v45 = vpop.f32.mrf.mxu1 }
 0x188   : > { %970 = vst [vmem:[%s2004_s28 + $0x88] sm:$0xff] %v531_v44  ;;  %972 = vst [vmem:[%s2004_s28 + $0x98] sm:$0xff] %v788_v45 }
 0x189   : > { %v535_v46 = vpop.f32.mrf.mxu0  ;;  %v792_v47 = vpop.f32.mrf.mxu1 }
 0x18a   : > { %973 = vst [vmem:[%s2004_s28 + $0xa0] sm:$0xff] %v535_v46  ;;  %975 = vst [vmem:[%s2004_s28 + $0xb0] sm:$0xff] %v792_v47 }
 0x18b   : > { %v537_v48 = vpop.f32.mrf.mxu0  ;;  %v794_v49 = vpop.f32.mrf.mxu1 }
 0x18c   : > { %974 = vst [vmem:[%s2004_s28 + $0xa8] sm:$0xff] %v537_v48  ;;  %976 = vst [vmem:[%s2004_s28 + $0xb8] sm:$0xff] %v794_v49 }
 0x18d   : > { %v541_v50 = vpop.f32.mrf.mxu0  ;;  %v798_v51 = vpop.f32.mrf.mxu1 }
 0x18e   : > { %977 = vst [vmem:[%s2004_s28 + $0xc0] sm:$0xff] %v541_v50  ;;  %979 = vst [vmem:[%s2004_s28 + $0xd0] sm:$0xff] %v798_v51 }
 0x18f   : > { %v543_v52 = vpop.f32.mrf.mxu0  ;;  %v800_v53 = vpop.f32.mrf.mxu1 }
 0x190   : > { %978 = vst [vmem:[%s2004_s28 + $0xc8] sm:$0xff] %v543_v52  ;;  %980 = vst [vmem:[%s2004_s28 + $0xd8] sm:$0xff] %v800_v53 }
 0x191   : > { %v547_v54 = vpop.f32.mrf.mxu0  ;;  %v804_v55 = vpop.f32.mrf.mxu1 }
 0x192   : > { %981 = vst [vmem:[%s2004_s28 + $0xe0] sm:$0xff] %v547_v54  ;;  %983 = vst [vmem:[%s2004_s28 + $0xf0] sm:$0xff] %v804_v55 }
 0x193   : > { %v549_v56 = vpop.f32.mrf.mxu0  ;;  %v806_v57 = vpop.f32.mrf.mxu1 }
 0x194   : > { %982 = vst [vmem:[%s2004_s28 + $0xe8] sm:$0xff] %v549_v56  ;;  %984 = vst [vmem:[%s2004_s28 + $0xf8] sm:$0xff] %v806_v57 }
 0x195   : > { %v553_v58 = vpop.f32.mrf.mxu0  ;;  %v810_v59 = vpop.f32.mrf.mxu1 }
 0x196   : > { %985 = vst [vmem:[%s2004_s28 + $0x100] sm:$0xff] %v553_v58  ;;  %987 = vst [vmem:[%s2004_s28 + $0x110] sm:$0xff] %v810_v59 }
 0x197   : > { %v555_v60 = vpop.f32.mrf.mxu0  ;;  %v812_v61 = vpop.f32.mrf.mxu1 }
 0x198   : > { %986 = vst [vmem:[%s2004_s28 + $0x108] sm:$0xff] %v555_v60  ;;  %988 = vst [vmem:[%s2004_s28 + $0x118] sm:$0xff] %v812_v61 }
 0x199   : > { %v559_v62 = vpop.f32.mrf.mxu0  ;;  %v816_v63 = vpop.f32.mrf.mxu1 }
 0x19a   : > { %989 = vst [vmem:[%s2004_s28 + $0x120] sm:$0xff] %v559_v62  ;;  %991 = vst [vmem:[%s2004_s28 + $0x130] sm:$0xff] %v816_v63 }
 0x19b   : > { %v561_v0 = vpop.f32.mrf.mxu0  ;;  %v818_v1 = vpop.f32.mrf.mxu1 }
 0x19c   : > { %990 = vst [vmem:[%s2004_s28 + $0x128] sm:$0xff] %v561_v0  ;;  %992 = vst [vmem:[%s2004_s28 + $0x138] sm:$0xff] %v818_v1 }
 0x19d   : > { %v565_v2 = vpop.f32.mrf.mxu0  ;;  %v822_v3 = vpop.f32.mrf.mxu1 }
 0x19e   : > { %993 = vst [vmem:[%s2004_s28 + $0x140] sm:$0xff] %v565_v2  ;;  %995 = vst [vmem:[%s2004_s28 + $0x150] sm:$0xff] %v822_v3 }
 0x19f   : > { %v567_v4 = vpop.f32.mrf.mxu0  ;;  %v824_v5 = vpop.f32.mrf.mxu1 }
 0x1a0   : > { %994 = vst [vmem:[%s2004_s28 + $0x148] sm:$0xff] %v567_v4  ;;  %996 = vst [vmem:[%s2004_s28 + $0x158] sm:$0xff] %v824_v5 }
 0x1a1   : > { %v571_v6 = vpop.f32.mrf.mxu0  ;;  %v828_v7 = vpop.f32.mrf.mxu1 }
 0x1a2   : > { %997 = vst [vmem:[%s2004_s28 + $0x160] sm:$0xff] %v571_v6  ;;  %999 = vst [vmem:[%s2004_s28 + $0x170] sm:$0xff] %v828_v7 }
 0x1a3   : > { %v573_v8 = vpop.f32.mrf.mxu0  ;;  %v830_v9 = vpop.f32.mrf.mxu1 }
 0x1a4   : > { %998 = vst [vmem:[%s2004_s28 + $0x168] sm:$0xff] %v573_v8  ;;  %1000 = vst [vmem:[%s2004_s28 + $0x178] sm:$0xff] %v830_v9 }
 0x1a5   : > { %v577_v10 = vpop.f32.mrf.mxu0  ;;  %v834_v11 = vpop.f32.mrf.mxu1 }
 0x1a6   : > { %1001 = vst [vmem:[%s2004_s28 + $0x180] sm:$0xff] %v577_v10  ;;  %1003 = vst [vmem:[%s2004_s28 + $0x190] sm:$0xff] %v834_v11 }
 0x1a7   : > { %v579_v12 = vpop.f32.mrf.mxu0  ;;  %v836_v13 = vpop.f32.mrf.mxu1 }
 0x1a8   : > { %1002 = vst [vmem:[%s2004_s28 + $0x188] sm:$0xff] %v579_v12  ;;  %1004 = vst [vmem:[%s2004_s28 + $0x198] sm:$0xff] %v836_v13 }
 0x1a9   : > { %v583_v14 = vpop.f32.mrf.mxu0  ;;  %v840_v15 = vpop.f32.mrf.mxu1 }
 0x1aa   : > { %1005 = vst [vmem:[%s2004_s28 + $0x1a0] sm:$0xff] %v583_v14  ;;  %1007 = vst [vmem:[%s2004_s28 + $0x1b0] sm:$0xff] %v840_v15 }
 0x1ab   : > { %v585_v16 = vpop.f32.mrf.mxu0  ;;  %v842_v17 = vpop.f32.mrf.mxu1 }
 0x1ac   : > { %1006 = vst [vmem:[%s2004_s28 + $0x1a8] sm:$0xff] %v585_v16  ;;  %1008 = vst [vmem:[%s2004_s28 + $0x1b8] sm:$0xff] %v842_v17 }
 0x1ad   : > { %v589_v18 = vpop.f32.mrf.mxu0  ;;  %v846_v19 = vpop.f32.mrf.mxu1 }
 0x1ae   : > { %1009 = vst [vmem:[%s2004_s28 + $0x1c0] sm:$0xff] %v589_v18  ;;  %1011 = vst [vmem:[%s2004_s28 + $0x1d0] sm:$0xff] %v846_v19 }
 0x1af   : > { %v591_v20 = vpop.f32.mrf.mxu0  ;;  %v848_v22 = vpop.f32.mrf.mxu1 }
 0x1b0   : > { %1010 = vst [vmem:[%s2004_s28 + $0x1c8] sm:$0xff] %v591_v20  ;;  %1012 = vst [vmem:[%s2004_s28 + $0x1d8] sm:$0xff] %v848_v22 }
 0x1b1   : > { %v595_v23 = vpop.f32.mrf.mxu0  ;;  %v852_v24 = vpop.f32.mrf.mxu1 }
 0x1b2   : > { %1013 = vst [vmem:[%s2004_s28 + $0x1e0] sm:$0xff] %v595_v23  ;;  %1015 = vst [vmem:[%s2004_s28 + $0x1f0] sm:$0xff] %v852_v24 }
 0x1b3   : > { %v597_v25 = vpop.f32.mrf.mxu0  ;;  %v854_v26 = vpop.f32.mrf.mxu1 }
 0x1b4   : > { %1014 = vst [vmem:[%s2004_s28 + $0x1e8] sm:$0xff] %v597_v25  ;;  %1016 = vst [vmem:[%s2004_s28 + $0x1f8] sm:$0xff] %v854_v26 }
 0x1b5   : > { %v601_v27 = vpop.f32.mrf.mxu0  ;;  %v858_v28 = vpop.f32.mrf.mxu1 }
 0x1b6   : > { %1017 = vst [vmem:[%s2004_s28 + $0x200] sm:$0xff] %v601_v27  ;;  %1019 = vst [vmem:[%s2004_s28 + $0x210] sm:$0xff] %v858_v28  ;;  %v1106_v27 = vld [vmem:[%s2004_s28] sm:$0xff] (%p1770_p9)  ;;  %v1108_v28 = vld [vmem:[%s2004_s28 + $0x8] sm:$0xff] (%p1770_p9) }
 0x1b7   : > { %v603_v21 = vpop.f32.mrf.mxu0  ;;  %v860_v29 = vpop.f32.mrf.mxu1  ;;  %1107 = vst [vmem:[%s2150_s8] sm:$0xff] (%p1770_p9), %v1106_v27  ;;  %1109 = vst [vmem:[%s2150_s8 + $0x8] sm:$0xff] (%p1770_p9), %v1108_v28 }
 0x1b8   : > { %1018 = vst [vmem:[%s2004_s28 + $0x208] sm:$0xff] %v603_v21  ;;  %1020 = vst [vmem:[%s2004_s28 + $0x218] sm:$0xff] %v860_v29  ;;  %v1110_v21 = vld [vmem:[%s2004_s28 + $0x10] sm:$0xff] (%p1770_p9)  ;;  %v1112_v29 = vld [vmem:[%s2004_s28 + $0x18] sm:$0xff] (%p1770_p9) }
 0x1b9   : > { %v607_v30 = vpop.f32.mrf.mxu0  ;;  %v864_v31 = vpop.f32.mrf.mxu1  ;;  %1111 = vst [vmem:[%s2150_s8 + $0x10] sm:$0xff] (%p1770_p9), %v1110_v21  ;;  %1113 = vst [vmem:[%s2150_s8 + $0x18] sm:$0xff] (%p1770_p9), %v1112_v29 }
 0x1ba   : > { %1021 = vst [vmem:[%s2004_s28 + $0x220] sm:$0xff] %v607_v30  ;;  %1023 = vst [vmem:[%s2004_s28 + $0x230] sm:$0xff] %v864_v31  ;;  %v1114_v30 = vld [vmem:[%s2004_s28 + $0x20] sm:$0xff] (%p1770_p9)  ;;  %v1116_v31 = vld [vmem:[%s2004_s28 + $0x28] sm:$0xff] (%p1770_p9) }
 0x1bb   : > { %v609_v32 = vpop.f32.mrf.mxu0  ;;  %v866_v33 = vpop.f32.mrf.mxu1  ;;  %1115 = vst [vmem:[%s2150_s8 + $0x40] sm:$0xff] (%p1770_p9), %v1114_v30  ;;  %1117 = vst [vmem:[%s2150_s8 + $0x48] sm:$0xff] (%p1770_p9), %v1116_v31 }
 0x1bc   : > { %1022 = vst [vmem:[%s2004_s28 + $0x228] sm:$0xff] %v609_v32  ;;  %1024 = vst [vmem:[%s2004_s28 + $0x238] sm:$0xff] %v866_v33  ;;  %v1118_v32 = vld [vmem:[%s2004_s28 + $0x30] sm:$0xff] (%p1770_p9)  ;;  %v1120_v33 = vld [vmem:[%s2004_s28 + $0x38] sm:$0xff] (%p1770_p9) }
 0x1bd   : > { %v613_v34 = vpop.f32.mrf.mxu0  ;;  %v870_v35 = vpop.f32.mrf.mxu1  ;;  %1119 = vst [vmem:[%s2150_s8 + $0x50] sm:$0xff] (%p1770_p9), %v1118_v32  ;;  %1121 = vst [vmem:[%s2150_s8 + $0x58] sm:$0xff] (%p1770_p9), %v1120_v33  ;;  %v1234_v27 = vld [vmem:[%s2004_s28 + $0x200] sm:$0xff] (%p1770_p9)  ;;  %v1238_v21 = vld [vmem:[%s2004_s28 + $0x210] sm:$0xff] (%p1770_p9) }
 0x1be   : > { %1025 = vst [vmem:[%s2004_s28 + $0x240] sm:$0xff] %v613_v34  ;;  %1027 = vst [vmem:[%s2004_s28 + $0x250] sm:$0xff] %v870_v35  ;;  %v1122_v34 = vld [vmem:[%s2004_s28 + $0x40] sm:$0xff] (%p1770_p9)  ;;  %v1124_v35 = vld [vmem:[%s2004_s28 + $0x48] sm:$0xff] (%p1770_p9) }
 0x1bf   : > { %v615_v36 = vpop.f32.mrf.mxu0  ;;  %v872_v37 = vpop.f32.mrf.mxu1  ;;  %1123 = vst [vmem:[%s2150_s8 + $0x80] sm:$0xff] (%p1770_p9), %v1122_v34  ;;  %1125 = vst [vmem:[%s2150_s8 + $0x88] sm:$0xff] (%p1770_p9), %v1124_v35  ;;  %v1236_v28 = vld [vmem:[%s2004_s28 + $0x208] sm:$0xff] (%p1770_p9)  ;;  %v1240_v29 = vld [vmem:[%s2004_s28 + $0x218] sm:$0xff] (%p1770_p9) }
 0x1c0   : > { %1026 = vst [vmem:[%s2004_s28 + $0x248] sm:$0xff] %v615_v36  ;;  %1028 = vst [vmem:[%s2004_s28 + $0x258] sm:$0xff] %v872_v37  ;;  %v1126_v36 = vld [vmem:[%s2004_s28 + $0x50] sm:$0xff] (%p1770_p9)  ;;  %v1128_v37 = vld [vmem:[%s2004_s28 + $0x58] sm:$0xff] (%p1770_p9) }
 0x1c1   : > { %v619_v38 = vpop.f32.mrf.mxu0  ;;  %v876_v39 = vpop.f32.mrf.mxu1  ;;  %1127 = vst [vmem:[%s2150_s8 + $0x90] sm:$0xff] (%p1770_p9), %v1126_v36  ;;  %1129 = vst [vmem:[%s2150_s8 + $0x98] sm:$0xff] (%p1770_p9), %v1128_v37  ;;  %v1242_v30 = vld [vmem:[%s2004_s28 + $0x220] sm:$0xff] (%p1770_p9)  ;;  %v1246_v32 = vld [vmem:[%s2004_s28 + $0x230] sm:$0xff] (%p1770_p9) }
 0x1c2   : > { %1029 = vst [vmem:[%s2004_s28 + $0x260] sm:$0xff] %v619_v38  ;;  %1031 = vst [vmem:[%s2004_s28 + $0x270] sm:$0xff] %v876_v39  ;;  %v1130_v38 = vld [vmem:[%s2004_s28 + $0x60] sm:$0xff] (%p1770_p9)  ;;  %v1132_v39 = vld [vmem:[%s2004_s28 + $0x68] sm:$0xff] (%p1770_p9) }
 0x1c3   : > { %v621_v40 = vpop.f32.mrf.mxu0  ;;  %v878_v41 = vpop.f32.mrf.mxu1  ;;  %1131 = vst [vmem:[%s2150_s8 + $0xc0] sm:$0xff] (%p1770_p9), %v1130_v38  ;;  %1133 = vst [vmem:[%s2150_s8 + $0xc8] sm:$0xff] (%p1770_p9), %v1132_v39  ;;  %v1244_v31 = vld [vmem:[%s2004_s28 + $0x228] sm:$0xff] (%p1770_p9)  ;;  %v1248_v33 = vld [vmem:[%s2004_s28 + $0x238] sm:$0xff] (%p1770_p9) }
 0x1c4   : > { %1030 = vst [vmem:[%s2004_s28 + $0x268] sm:$0xff] %v621_v40  ;;  %1032 = vst [vmem:[%s2004_s28 + $0x278] sm:$0xff] %v878_v41  ;;  %v1134_v40 = vld [vmem:[%s2004_s28 + $0x70] sm:$0xff] (%p1770_p9)  ;;  %v1136_v41 = vld [vmem:[%s2004_s28 + $0x78] sm:$0xff] (%p1770_p9) }
 0x1c5   : > { %v625_v42 = vpop.f32.mrf.mxu0  ;;  %v882_v43 = vpop.f32.mrf.mxu1  ;;  %1135 = vst [vmem:[%s2150_s8 + $0xd0] sm:$0xff] (%p1770_p9), %v1134_v40  ;;  %1137 = vst [vmem:[%s2150_s8 + $0xd8] sm:$0xff] (%p1770_p9), %v1136_v41  ;;  %v1250_v34 = vld [vmem:[%s2004_s28 + $0x240] sm:$0xff] (%p1770_p9)  ;;  %v1254_v36 = vld [vmem:[%s2004_s28 + $0x250] sm:$0xff] (%p1770_p9) }
 0x1c6   : > { %1033 = vst [vmem:[%s2004_s28 + $0x280] sm:$0xff] %v625_v42  ;;  %1035 = vst [vmem:[%s2004_s28 + $0x290] sm:$0xff] %v882_v43  ;;  %v1138_v42 = vld [vmem:[%s2004_s28 + $0x80] sm:$0xff] (%p1770_p9)  ;;  %v1140_v43 = vld [vmem:[%s2004_s28 + $0x88] sm:$0xff] (%p1770_p9) }
 0x1c7   : > { %v627_v44 = vpop.f32.mrf.mxu0  ;;  %v884_v45 = vpop.f32.mrf.mxu1  ;;  %1139 = vst [vmem:[%s2150_s8 + $0x100] sm:$0xff] (%p1770_p9), %v1138_v42  ;;  %1141 = vst [vmem:[%s2150_s8 + $0x108] sm:$0xff] (%p1770_p9), %v1140_v43  ;;  %v1252_v35 = vld [vmem:[%s2004_s28 + $0x248] sm:$0xff] (%p1770_p9)  ;;  %v1256_v37 = vld [vmem:[%s2004_s28 + $0x258] sm:$0xff] (%p1770_p9) }
 0x1c8   : > { %1034 = vst [vmem:[%s2004_s28 + $0x288] sm:$0xff] %v627_v44  ;;  %1036 = vst [vmem:[%s2004_s28 + $0x298] sm:$0xff] %v884_v45  ;;  %v1142_v44 = vld [vmem:[%s2004_s28 + $0x90] sm:$0xff] (%p1770_p9)  ;;  %v1144_v45 = vld [vmem:[%s2004_s28 + $0x98] sm:$0xff] (%p1770_p9) }
 0x1c9   : > { %v631_v46 = vpop.f32.mrf.mxu0  ;;  %v888_v47 = vpop.f32.mrf.mxu1  ;;  %1143 = vst [vmem:[%s2150_s8 + $0x110] sm:$0xff] (%p1770_p9), %v1142_v44  ;;  %1145 = vst [vmem:[%s2150_s8 + $0x118] sm:$0xff] (%p1770_p9), %v1144_v45  ;;  %v1258_v38 = vld [vmem:[%s2004_s28 + $0x260] sm:$0xff] (%p1770_p9)  ;;  %v1262_v40 = vld [vmem:[%s2004_s28 + $0x270] sm:$0xff] (%p1770_p9) }
 0x1ca   : > { %1037 = vst [vmem:[%s2004_s28 + $0x2a0] sm:$0xff] %v631_v46  ;;  %1039 = vst [vmem:[%s2004_s28 + $0x2b0] sm:$0xff] %v888_v47  ;;  %v1146_v46 = vld [vmem:[%s2004_s28 + $0xa0] sm:$0xff] (%p1770_p9)  ;;  %v1148_v47 = vld [vmem:[%s2004_s28 + $0xa8] sm:$0xff] (%p1770_p9) }
 0x1cb   : > { %v633_v48 = vpop.f32.mrf.mxu0  ;;  %v890_v49 = vpop.f32.mrf.mxu1  ;;  %1147 = vst [vmem:[%s2150_s8 + $0x140] sm:$0xff] (%p1770_p9), %v1146_v46  ;;  %1149 = vst [vmem:[%s2150_s8 + $0x148] sm:$0xff] (%p1770_p9), %v1148_v47  ;;  %v1260_v39 = vld [vmem:[%s2004_s28 + $0x268] sm:$0xff] (%p1770_p9)  ;;  %v1264_v41 = vld [vmem:[%s2004_s28 + $0x278] sm:$0xff] (%p1770_p9) }
 0x1cc   : > { %1038 = vst [vmem:[%s2004_s28 + $0x2a8] sm:$0xff] %v633_v48  ;;  %1040 = vst [vmem:[%s2004_s28 + $0x2b8] sm:$0xff] %v890_v49  ;;  %v1150_v48 = vld [vmem:[%s2004_s28 + $0xb0] sm:$0xff] (%p1770_p9)  ;;  %v1152_v49 = vld [vmem:[%s2004_s28 + $0xb8] sm:$0xff] (%p1770_p9) }
 0x1cd   : > { %v637_v50 = vpop.f32.mrf.mxu0  ;;  %v894_v51 = vpop.f32.mrf.mxu1  ;;  %1151 = vst [vmem:[%s2150_s8 + $0x150] sm:$0xff] (%p1770_p9), %v1150_v48  ;;  %1153 = vst [vmem:[%s2150_s8 + $0x158] sm:$0xff] (%p1770_p9), %v1152_v49  ;;  %v1266_v42 = vld [vmem:[%s2004_s28 + $0x280] sm:$0xff] (%p1770_p9)  ;;  %v1270_v44 = vld [vmem:[%s2004_s28 + $0x290] sm:$0xff] (%p1770_p9) }
 0x1ce   : > { %1041 = vst [vmem:[%s2004_s28 + $0x2c0] sm:$0xff] %v637_v50  ;;  %1043 = vst [vmem:[%s2004_s28 + $0x2d0] sm:$0xff] %v894_v51  ;;  %v1154_v50 = vld [vmem:[%s2004_s28 + $0xc0] sm:$0xff] (%p1770_p9)  ;;  %v1156_v51 = vld [vmem:[%s2004_s28 + $0xc8] sm:$0xff] (%p1770_p9) }
 0x1cf   : > { %v639_v52 = vpop.f32.mrf.mxu0  ;;  %v896_v53 = vpop.f32.mrf.mxu1  ;;  %1155 = vst [vmem:[%s2150_s8 + $0x180] sm:$0xff] (%p1770_p9), %v1154_v50  ;;  %1157 = vst [vmem:[%s2150_s8 + $0x188] sm:$0xff] (%p1770_p9), %v1156_v51  ;;  %v1268_v43 = vld [vmem:[%s2004_s28 + $0x288] sm:$0xff] (%p1770_p9)  ;;  %v1272_v45 = vld [vmem:[%s2004_s28 + $0x298] sm:$0xff] (%p1770_p9) }
 0x1d0   : > { %1042 = vst [vmem:[%s2004_s28 + $0x2c8] sm:$0xff] %v639_v52  ;;  %1044 = vst [vmem:[%s2004_s28 + $0x2d8] sm:$0xff] %v896_v53  ;;  %v1158_v52 = vld [vmem:[%s2004_s28 + $0xd0] sm:$0xff] (%p1770_p9)  ;;  %v1160_v53 = vld [vmem:[%s2004_s28 + $0xd8] sm:$0xff] (%p1770_p9) }
 0x1d1   : > { %v643_v54 = vpop.f32.mrf.mxu0  ;;  %v900_v55 = vpop.f32.mrf.mxu1  ;;  %1159 = vst [vmem:[%s2150_s8 + $0x190] sm:$0xff] (%p1770_p9), %v1158_v52  ;;  %1161 = vst [vmem:[%s2150_s8 + $0x198] sm:$0xff] (%p1770_p9), %v1160_v53  ;;  %v1274_v46 = vld [vmem:[%s2004_s28 + $0x2a0] sm:$0xff] (%p1770_p9)  ;;  %v1278_v48 = vld [vmem:[%s2004_s28 + $0x2b0] sm:$0xff] (%p1770_p9) }
 0x1d2   : > { %1045 = vst [vmem:[%s2004_s28 + $0x2e0] sm:$0xff] %v643_v54  ;;  %1047 = vst [vmem:[%s2004_s28 + $0x2f0] sm:$0xff] %v900_v55  ;;  %v1162_v54 = vld [vmem:[%s2004_s28 + $0xe0] sm:$0xff] (%p1770_p9)  ;;  %v1164_v55 = vld [vmem:[%s2004_s28 + $0xe8] sm:$0xff] (%p1770_p9) }
 0x1d3   : > { %v645_v56 = vpop.f32.mrf.mxu0  ;;  %v902_v57 = vpop.f32.mrf.mxu1  ;;  %1163 = vst [vmem:[%s2150_s8 + $0x1c0] sm:$0xff] (%p1770_p9), %v1162_v54  ;;  %1165 = vst [vmem:[%s2150_s8 + $0x1c8] sm:$0xff] (%p1770_p9), %v1164_v55  ;;  %v1276_v47 = vld [vmem:[%s2004_s28 + $0x2a8] sm:$0xff] (%p1770_p9)  ;;  %v1280_v49 = vld [vmem:[%s2004_s28 + $0x2b8] sm:$0xff] (%p1770_p9) }
 0x1d4   : > { %1046 = vst [vmem:[%s2004_s28 + $0x2e8] sm:$0xff] %v645_v56  ;;  %1048 = vst [vmem:[%s2004_s28 + $0x2f8] sm:$0xff] %v902_v57  ;;  %v1166_v56 = vld [vmem:[%s2004_s28 + $0xf0] sm:$0xff] (%p1770_p9)  ;;  %v1168_v57 = vld [vmem:[%s2004_s28 + $0xf8] sm:$0xff] (%p1770_p9) }
 0x1d5   : > { %v649_v58 = vpop.f32.mrf.mxu0  ;;  %v906_v59 = vpop.f32.mrf.mxu1  ;;  %1167 = vst [vmem:[%s2150_s8 + $0x1d0] sm:$0xff] (%p1770_p9), %v1166_v56  ;;  %1169 = vst [vmem:[%s2150_s8 + $0x1d8] sm:$0xff] (%p1770_p9), %v1168_v57  ;;  %v1282_v50 = vld [vmem:[%s2004_s28 + $0x2c0] sm:$0xff] (%p1770_p9)  ;;  %v1286_v52 = vld [vmem:[%s2004_s28 + $0x2d0] sm:$0xff] (%p1770_p9) }
 0x1d6   : > { %1049 = vst [vmem:[%s2004_s28 + $0x300] sm:$0xff] %v649_v58  ;;  %1051 = vst [vmem:[%s2004_s28 + $0x310] sm:$0xff] %v906_v59  ;;  %v1170_v58 = vld [vmem:[%s2004_s28 + $0x100] sm:$0xff] (%p1770_p9)  ;;  %v1172_v59 = vld [vmem:[%s2004_s28 + $0x108] sm:$0xff] (%p1770_p9) }
 0x1d7   : > { %v651_v60 = vpop.f32.mrf.mxu0  ;;  %v908_v61 = vpop.f32.mrf.mxu1  ;;  %1171 = vst [vmem:[%s2150_s8 + $0x200] sm:$0xff] (%p1770_p9), %v1170_v58  ;;  %1173 = vst [vmem:[%s2150_s8 + $0x208] sm:$0xff] (%p1770_p9), %v1172_v59  ;;  %v1284_v51 = vld [vmem:[%s2004_s28 + $0x2c8] sm:$0xff] (%p1770_p9)  ;;  %v1288_v53 = vld [vmem:[%s2004_s28 + $0x2d8] sm:$0xff] (%p1770_p9) }
 0x1d8   : > { %1050 = vst [vmem:[%s2004_s28 + $0x308] sm:$0xff] %v651_v60  ;;  %1052 = vst [vmem:[%s2004_s28 + $0x318] sm:$0xff] %v908_v61  ;;  %v1174_v60 = vld [vmem:[%s2004_s28 + $0x110] sm:$0xff] (%p1770_p9)  ;;  %v1176_v61 = vld [vmem:[%s2004_s28 + $0x118] sm:$0xff] (%p1770_p9) }
 0x1d9   : > { %v655_v62 = vpop.f32.mrf.mxu0  ;;  %v912_v63 = vpop.f32.mrf.mxu1  ;;  %1175 = vst [vmem:[%s2150_s8 + $0x210] sm:$0xff] (%p1770_p9), %v1174_v60  ;;  %1177 = vst [vmem:[%s2150_s8 + $0x218] sm:$0xff] (%p1770_p9), %v1176_v61  ;;  %v1290_v54 = vld [vmem:[%s2004_s28 + $0x2e0] sm:$0xff] (%p1770_p9)  ;;  %v1294_v56 = vld [vmem:[%s2004_s28 + $0x2f0] sm:$0xff] (%p1770_p9) }
 0x1da   : > { %1053 = vst [vmem:[%s2004_s28 + $0x320] sm:$0xff] %v655_v62  ;;  %1055 = vst [vmem:[%s2004_s28 + $0x330] sm:$0xff] %v912_v63  ;;  %v1178_v62 = vld [vmem:[%s2004_s28 + $0x120] sm:$0xff] (%p1770_p9)  ;;  %v1180_v63 = vld [vmem:[%s2004_s28 + $0x128] sm:$0xff] (%p1770_p9) }
 0x1db   : > { %v657_v0 = vpop.f32.mrf.mxu0  ;;  %v914_v1 = vpop.f32.mrf.mxu1  ;;  %1179 = vst [vmem:[%s2150_s8 + $0x240] sm:$0xff] (%p1770_p9), %v1178_v62  ;;  %1181 = vst [vmem:[%s2150_s8 + $0x248] sm:$0xff] (%p1770_p9), %v1180_v63  ;;  %v1292_v55 = vld [vmem:[%s2004_s28 + $0x2e8] sm:$0xff] (%p1770_p9)  ;;  %v1296_v57 = vld [vmem:[%s2004_s28 + $0x2f8] sm:$0xff] (%p1770_p9) }
 0x1dc   : > { %1054 = vst [vmem:[%s2004_s28 + $0x328] sm:$0xff] %v657_v0  ;;  %1056 = vst [vmem:[%s2004_s28 + $0x338] sm:$0xff] %v914_v1  ;;  %v1182_v0 = vld [vmem:[%s2004_s28 + $0x130] sm:$0xff] (%p1770_p9)  ;;  %v1184_v1 = vld [vmem:[%s2004_s28 + $0x138] sm:$0xff] (%p1770_p9) }
 0x1dd   : > { %v661_v2 = vpop.f32.mrf.mxu0  ;;  %v918_v3 = vpop.f32.mrf.mxu1  ;;  %1183 = vst [vmem:[%s2150_s8 + $0x250] sm:$0xff] (%p1770_p9), %v1182_v0  ;;  %1185 = vst [vmem:[%s2150_s8 + $0x258] sm:$0xff] (%p1770_p9), %v1184_v1  ;;  %v1298_v58 = vld [vmem:[%s2004_s28 + $0x300] sm:$0xff] (%p1770_p9)  ;;  %v1302_v60 = vld [vmem:[%s2004_s28 + $0x310] sm:$0xff] (%p1770_p9) }
 0x1de   : > { %1057 = vst [vmem:[%s2004_s28 + $0x340] sm:$0xff] %v661_v2  ;;  %1059 = vst [vmem:[%s2004_s28 + $0x350] sm:$0xff] %v918_v3  ;;  %v1186_v2 = vld [vmem:[%s2004_s28 + $0x140] sm:$0xff] (%p1770_p9)  ;;  %v1188_v3 = vld [vmem:[%s2004_s28 + $0x148] sm:$0xff] (%p1770_p9) }
 0x1df   : > { %v663_v4 = vpop.f32.mrf.mxu0  ;;  %v920_v5 = vpop.f32.mrf.mxu1  ;;  %1187 = vst [vmem:[%s2150_s8 + $0x280] sm:$0xff] (%p1770_p9), %v1186_v2  ;;  %1189 = vst [vmem:[%s2150_s8 + $0x288] sm:$0xff] (%p1770_p9), %v1188_v3  ;;  %v1300_v59 = vld [vmem:[%s2004_s28 + $0x308] sm:$0xff] (%p1770_p9)  ;;  %v1304_v61 = vld [vmem:[%s2004_s28 + $0x318] sm:$0xff] (%p1770_p9) }
 0x1e0   : > { %1058 = vst [vmem:[%s2004_s28 + $0x348] sm:$0xff] %v663_v4  ;;  %1060 = vst [vmem:[%s2004_s28 + $0x358] sm:$0xff] %v920_v5  ;;  %v1190_v4 = vld [vmem:[%s2004_s28 + $0x150] sm:$0xff] (%p1770_p9)  ;;  %v1192_v5 = vld [vmem:[%s2004_s28 + $0x158] sm:$0xff] (%p1770_p9) }
 0x1e1   : > { %v667_v6 = vpop.f32.mrf.mxu0  ;;  %v924_v7 = vpop.f32.mrf.mxu1  ;;  %1191 = vst [vmem:[%s2150_s8 + $0x290] sm:$0xff] (%p1770_p9), %v1190_v4  ;;  %1193 = vst [vmem:[%s2150_s8 + $0x298] sm:$0xff] (%p1770_p9), %v1192_v5  ;;  %v1306_v62 = vld [vmem:[%s2004_s28 + $0x320] sm:$0xff] (%p1770_p9)  ;;  %v1310_v0 = vld [vmem:[%s2004_s28 + $0x330] sm:$0xff] (%p1770_p9) }
 0x1e2   : > { %1061 = vst [vmem:[%s2004_s28 + $0x360] sm:$0xff] %v667_v6  ;;  %1063 = vst [vmem:[%s2004_s28 + $0x370] sm:$0xff] %v924_v7  ;;  %v1194_v6 = vld [vmem:[%s2004_s28 + $0x160] sm:$0xff] (%p1770_p9)  ;;  %v1196_v7 = vld [vmem:[%s2004_s28 + $0x168] sm:$0xff] (%p1770_p9) }
 0x1e3   : > { %v669_v8 = vpop.f32.mrf.mxu0  ;;  %v926_v9 = vpop.f32.mrf.mxu1  ;;  %1195 = vst [vmem:[%s2150_s8 + $0x2c0] sm:$0xff] (%p1770_p9), %v1194_v6  ;;  %1197 = vst [vmem:[%s2150_s8 + $0x2c8] sm:$0xff] (%p1770_p9), %v1196_v7  ;;  %v1308_v63 = vld [vmem:[%s2004_s28 + $0x328] sm:$0xff] (%p1770_p9)  ;;  %v1312_v1 = vld [vmem:[%s2004_s28 + $0x338] sm:$0xff] (%p1770_p9) }
 0x1e4   : > { %1062 = vst [vmem:[%s2004_s28 + $0x368] sm:$0xff] %v669_v8  ;;  %1064 = vst [vmem:[%s2004_s28 + $0x378] sm:$0xff] %v926_v9  ;;  %v1198_v8 = vld [vmem:[%s2004_s28 + $0x170] sm:$0xff] (%p1770_p9)  ;;  %v1200_v9 = vld [vmem:[%s2004_s28 + $0x178] sm:$0xff] (%p1770_p9) }
 0x1e5   : > { %v673_v10 = vpop.f32.mrf.mxu0  ;;  %v930_v11 = vpop.f32.mrf.mxu1  ;;  %1199 = vst [vmem:[%s2150_s8 + $0x2d0] sm:$0xff] (%p1770_p9), %v1198_v8  ;;  %1201 = vst [vmem:[%s2150_s8 + $0x2d8] sm:$0xff] (%p1770_p9), %v1200_v9  ;;  %v1314_v2 = vld [vmem:[%s2004_s28 + $0x340] sm:$0xff] (%p1770_p9)  ;;  %v1318_v4 = vld [vmem:[%s2004_s28 + $0x350] sm:$0xff] (%p1770_p9) }
 0x1e6   : > { %1065 = vst [vmem:[%s2004_s28 + $0x380] sm:$0xff] %v673_v10  ;;  %1067 = vst [vmem:[%s2004_s28 + $0x390] sm:$0xff] %v930_v11  ;;  %v1202_v10 = vld [vmem:[%s2004_s28 + $0x180] sm:$0xff] (%p1770_p9)  ;;  %v1204_v11 = vld [vmem:[%s2004_s28 + $0x188] sm:$0xff] (%p1770_p9) }
 0x1e7   : > { %v675_v12 = vpop.f32.mrf.mxu0  ;;  %v932_v13 = vpop.f32.mrf.mxu1  ;;  %1203 = vst [vmem:[%s2150_s8 + $0x300] sm:$0xff] (%p1770_p9), %v1202_v10  ;;  %1205 = vst [vmem:[%s2150_s8 + $0x308] sm:$0xff] (%p1770_p9), %v1204_v11  ;;  %v1316_v3 = vld [vmem:[%s2004_s28 + $0x348] sm:$0xff] (%p1770_p9)  ;;  %v1320_v5 = vld [vmem:[%s2004_s28 + $0x358] sm:$0xff] (%p1770_p9) }
 0x1e8   : > { %1066 = vst [vmem:[%s2004_s28 + $0x388] sm:$0xff] %v675_v12  ;;  %1068 = vst [vmem:[%s2004_s28 + $0x398] sm:$0xff] %v932_v13  ;;  %v1206_v12 = vld [vmem:[%s2004_s28 + $0x190] sm:$0xff] (%p1770_p9)  ;;  %v1208_v13 = vld [vmem:[%s2004_s28 + $0x198] sm:$0xff] (%p1770_p9) }
 0x1e9   : > { %v679_v14 = vpop.f32.mrf.mxu0  ;;  %v936_v15 = vpop.f32.mrf.mxu1  ;;  %1207 = vst [vmem:[%s2150_s8 + $0x310] sm:$0xff] (%p1770_p9), %v1206_v12  ;;  %1209 = vst [vmem:[%s2150_s8 + $0x318] sm:$0xff] (%p1770_p9), %v1208_v13  ;;  %v1322_v6 = vld [vmem:[%s2004_s28 + $0x360] sm:$0xff] (%p1770_p9)  ;;  %v1326_v8 = vld [vmem:[%s2004_s28 + $0x370] sm:$0xff] (%p1770_p9) }
 0x1ea   : > { %1069 = vst [vmem:[%s2004_s28 + $0x3a0] sm:$0xff] %v679_v14  ;;  %1071 = vst [vmem:[%s2004_s28 + $0x3b0] sm:$0xff] %v936_v15  ;;  %v1210_v14 = vld [vmem:[%s2004_s28 + $0x1a0] sm:$0xff] (%p1770_p9)  ;;  %v1212_v15 = vld [vmem:[%s2004_s28 + $0x1a8] sm:$0xff] (%p1770_p9) }
 0x1eb   : > { %v681_v16 = vpop.f32.mrf.mxu0  ;;  %v938_v17 = vpop.f32.mrf.mxu1  ;;  %1211 = vst [vmem:[%s2150_s8 + $0x340] sm:$0xff] (%p1770_p9), %v1210_v14  ;;  %1213 = vst [vmem:[%s2150_s8 + $0x348] sm:$0xff] (%p1770_p9), %v1212_v15  ;;  %v1324_v7 = vld [vmem:[%s2004_s28 + $0x368] sm:$0xff] (%p1770_p9)  ;;  %v1328_v9 = vld [vmem:[%s2004_s28 + $0x378] sm:$0xff] (%p1770_p9) }
 0x1ec   : > { %1070 = vst [vmem:[%s2004_s28 + $0x3a8] sm:$0xff] %v681_v16  ;;  %1072 = vst [vmem:[%s2004_s28 + $0x3b8] sm:$0xff] %v938_v17  ;;  %v1214_v16 = vld [vmem:[%s2004_s28 + $0x1b0] sm:$0xff] (%p1770_p9)  ;;  %v1216_v17 = vld [vmem:[%s2004_s28 + $0x1b8] sm:$0xff] (%p1770_p9) }
 0x1ed   : > { %v685_v18 = vpop.f32.mrf.mxu0  ;;  %v942_v19 = vpop.f32.mrf.mxu1  ;;  %1215 = vst [vmem:[%s2150_s8 + $0x350] sm:$0xff] (%p1770_p9), %v1214_v16  ;;  %1217 = vst [vmem:[%s2150_s8 + $0x358] sm:$0xff] (%p1770_p9), %v1216_v17  ;;  %v1330_v10 = vld [vmem:[%s2004_s28 + $0x380] sm:$0xff] (%p1770_p9)  ;;  %v1334_v12 = vld [vmem:[%s2004_s28 + $0x390] sm:$0xff] (%p1770_p9) }
 0x1ee   : > { %1073 = vst [vmem:[%s2004_s28 + $0x3c0] sm:$0xff] %v685_v18  ;;  %1075 = vst [vmem:[%s2004_s28 + $0x3d0] sm:$0xff] %v942_v19  ;;  %v1218_v18 = vld [vmem:[%s2004_s28 + $0x1c0] sm:$0xff] (%p1770_p9)  ;;  %v1220_v19 = vld [vmem:[%s2004_s28 + $0x1c8] sm:$0xff] (%p1770_p9) }
 0x1ef   : > { %v687_v20 = vpop.f32.mrf.mxu0  ;;  %v944_v22 = vpop.f32.mrf.mxu1  ;;  %1219 = vst [vmem:[%s2150_s8 + $0x380] sm:$0xff] (%p1770_p9), %v1218_v18  ;;  %1221 = vst [vmem:[%s2150_s8 + $0x388] sm:$0xff] (%p1770_p9), %v1220_v19  ;;  %v1332_v11 = vld [vmem:[%s2004_s28 + $0x388] sm:$0xff] (%p1770_p9)  ;;  %v1336_v13 = vld [vmem:[%s2004_s28 + $0x398] sm:$0xff] (%p1770_p9) }
 0x1f0   : > { %1074 = vst [vmem:[%s2004_s28 + $0x3c8] sm:$0xff] %v687_v20  ;;  %1076 = vst [vmem:[%s2004_s28 + $0x3d8] sm:$0xff] %v944_v22  ;;  %1087 = sbr.rel (!%p1770_p9) target bundleno = 534 (0x216), region = 59  ;;  %v1222_v20 = vld [vmem:[%s2004_s28 + $0x1d0] sm:$0xff] (%p1770_p9)  ;;  %v1224_v22 = vld [vmem:[%s2004_s28 + $0x1d8] sm:$0xff] (%p1770_p9) }
 0x1f1   : > { %v691_v23 = vpop.f32.mrf.mxu0  ;;  %v948_v24 = vpop.f32.mrf.mxu1  ;;  %1223 = vst [vmem:[%s2150_s8 + $0x390] sm:$0xff] (%p1770_p9), %v1222_v20  ;;  %1225 = vst [vmem:[%s2150_s8 + $0x398] sm:$0xff] (%p1770_p9), %v1224_v22  ;;  %v1338_v14 = vld [vmem:[%s2004_s28 + $0x3a0] sm:$0xff] (%p1770_p9)  ;;  %v1342_v16 = vld [vmem:[%s2004_s28 + $0x3b0] sm:$0xff] (%p1770_p9) }
 0x1f2   : > { %1077 = vst [vmem:[%s2004_s28 + $0x3e0] sm:$0xff] %v691_v23  ;;  %1079 = vst [vmem:[%s2004_s28 + $0x3f0] sm:$0xff] %v948_v24  ;;  %v1226_v23 = vld [vmem:[%s2004_s28 + $0x1e0] sm:$0xff] (%p1770_p9)  ;;  %v1228_v24 = vld [vmem:[%s2004_s28 + $0x1e8] sm:$0xff] (%p1770_p9) }
 0x1f3   : > { %v693_v25 = vpop.f32.mrf.mxu0  ;;  %v950_v26 = vpop.f32.mrf.mxu1  ;;  %1227 = vst [vmem:[%s2150_s8 + $0x3c0] sm:$0xff] (%p1770_p9), %v1226_v23  ;;  %1229 = vst [vmem:[%s2150_s8 + $0x3c8] sm:$0xff] (%p1770_p9), %v1228_v24  ;;  %v1340_v15 = vld [vmem:[%s2004_s28 + $0x3a8] sm:$0xff] (%p1770_p9)  ;;  %v1344_v17 = vld [vmem:[%s2004_s28 + $0x3b8] sm:$0xff] (%p1770_p9) }
 0x1f4   : > { %1078 = vst [vmem:[%s2004_s28 + $0x3e8] sm:$0xff] %v693_v25  ;;  %1080 = vst [vmem:[%s2004_s28 + $0x3f8] sm:$0xff] %v950_v26  ;;  %v1230_v25 = vld [vmem:[%s2004_s28 + $0x1f0] sm:$0xff] (%p1770_p9)  ;;  %v1232_v26 = vld [vmem:[%s2004_s28 + $0x1f8] sm:$0xff] (%p1770_p9) }
 0x1f5   : > { %1231 = vst [vmem:[%s2150_s8 + $0x3d0] sm:$0xff] %v1230_v25  ;;  %1233 = vst [vmem:[%s2150_s8 + $0x3d8] sm:$0xff] %v1232_v26  ;;  %v1346_v18 = vld [vmem:[%s2004_s28 + $0x3c0] sm:$0xff]  ;;  %v1350_v20 = vld [vmem:[%s2004_s28 + $0x3d0] sm:$0xff] }
 0x1f6   : > { %1235 = vst [vmem:[%s2150_s8 + $0x400] sm:$0xff] %v1234_v27  ;;  %1237 = vst [vmem:[%s2150_s8 + $0x408] sm:$0xff] %v1236_v28 }
 0x1f7   : > { %1239 = vst [vmem:[%s2150_s8 + $0x410] sm:$0xff] %v1238_v21  ;;  %1241 = vst [vmem:[%s2150_s8 + $0x418] sm:$0xff] %v1240_v29  ;;  %v1348_v19 = vld [vmem:[%s2004_s28 + $0x3c8] sm:$0xff]  ;;  %v1352_v22 = vld [vmem:[%s2004_s28 + $0x3d8] sm:$0xff] }
 0x1f8   : > { %1243 = vst [vmem:[%s2150_s8 + $0x440] sm:$0xff] %v1242_v30  ;;  %1245 = vst [vmem:[%s2150_s8 + $0x448] sm:$0xff] %v1244_v31 }
 0x1f9   : > { %1247 = vst [vmem:[%s2150_s8 + $0x450] sm:$0xff] %v1246_v32  ;;  %1249 = vst [vmem:[%s2150_s8 + $0x458] sm:$0xff] %v1248_v33  ;;  %v1354_v23 = vld [vmem:[%s2004_s28 + $0x3e0] sm:$0xff]  ;;  %v1358_v25 = vld [vmem:[%s2004_s28 + $0x3f0] sm:$0xff] }
 0x1fa   : > { %1251 = vst [vmem:[%s2150_s8 + $0x480] sm:$0xff] %v1250_v34  ;;  %1253 = vst [vmem:[%s2150_s8 + $0x488] sm:$0xff] %v1252_v35 }
 0x1fb   : > { %1255 = vst [vmem:[%s2150_s8 + $0x490] sm:$0xff] %v1254_v36  ;;  %1257 = vst [vmem:[%s2150_s8 + $0x498] sm:$0xff] %v1256_v37  ;;  %v1356_v24 = vld [vmem:[%s2004_s28 + $0x3e8] sm:$0xff]  ;;  %v1360_v26 = vld [vmem:[%s2004_s28 + $0x3f8] sm:$0xff] }
 0x1fc   : > { %1259 = vst [vmem:[%s2150_s8 + $0x4c0] sm:$0xff] %v1258_v38  ;;  %1261 = vst [vmem:[%s2150_s8 + $0x4c8] sm:$0xff] %v1260_v39 }
 0x1fd   : > { %1263 = vst [vmem:[%s2150_s8 + $0x4d0] sm:$0xff] %v1262_v40  ;;  %1265 = vst [vmem:[%s2150_s8 + $0x4d8] sm:$0xff] %v1264_v41 }
 0x1fe   : > { %1267 = vst [vmem:[%s2150_s8 + $0x500] sm:$0xff] %v1266_v42  ;;  %1269 = vst [vmem:[%s2150_s8 + $0x508] sm:$0xff] %v1268_v43 }
 0x1ff   : > { %1271 = vst [vmem:[%s2150_s8 + $0x510] sm:$0xff] %v1270_v44  ;;  %1273 = vst [vmem:[%s2150_s8 + $0x518] sm:$0xff] %v1272_v45 }
 0x200   : > { %1275 = vst [vmem:[%s2150_s8 + $0x540] sm:$0xff] %v1274_v46  ;;  %1277 = vst [vmem:[%s2150_s8 + $0x548] sm:$0xff] %v1276_v47 }
 0x201   : > { %1279 = vst [vmem:[%s2150_s8 + $0x550] sm:$0xff] %v1278_v48  ;;  %1281 = vst [vmem:[%s2150_s8 + $0x558] sm:$0xff] %v1280_v49 }
 0x202   : > { %1283 = vst [vmem:[%s2150_s8 + $0x580] sm:$0xff] %v1282_v50  ;;  %1285 = vst [vmem:[%s2150_s8 + $0x588] sm:$0xff] %v1284_v51 }
 0x203   : > { %1287 = vst [vmem:[%s2150_s8 + $0x590] sm:$0xff] %v1286_v52  ;;  %1289 = vst [vmem:[%s2150_s8 + $0x598] sm:$0xff] %v1288_v53 }
 0x204   : > { %1291 = vst [vmem:[%s2150_s8 + $0x5c0] sm:$0xff] %v1290_v54  ;;  %1293 = vst [vmem:[%s2150_s8 + $0x5c8] sm:$0xff] %v1292_v55 }
 0x205   : > { %1295 = vst [vmem:[%s2150_s8 + $0x5d0] sm:$0xff] %v1294_v56  ;;  %1297 = vst [vmem:[%s2150_s8 + $0x5d8] sm:$0xff] %v1296_v57 }
 0x206   : > { %1299 = vst [vmem:[%s2150_s8 + $0x600] sm:$0xff] %v1298_v58  ;;  %1301 = vst [vmem:[%s2150_s8 + $0x608] sm:$0xff] %v1300_v59 }
 0x207   : > { %1303 = vst [vmem:[%s2150_s8 + $0x610] sm:$0xff] %v1302_v60  ;;  %1305 = vst [vmem:[%s2150_s8 + $0x618] sm:$0xff] %v1304_v61 }
 0x208   : > { %1307 = vst [vmem:[%s2150_s8 + $0x640] sm:$0xff] %v1306_v62  ;;  %1309 = vst [vmem:[%s2150_s8 + $0x648] sm:$0xff] %v1308_v63 }
 0x209   : > { %1311 = vst [vmem:[%s2150_s8 + $0x650] sm:$0xff] %v1310_v0  ;;  %1313 = vst [vmem:[%s2150_s8 + $0x658] sm:$0xff] %v1312_v1 }
 0x20a   : > { %1315 = vst [vmem:[%s2150_s8 + $0x680] sm:$0xff] %v1314_v2  ;;  %1317 = vst [vmem:[%s2150_s8 + $0x688] sm:$0xff] %v1316_v3 }
 0x20b   : > { %1319 = vst [vmem:[%s2150_s8 + $0x690] sm:$0xff] %v1318_v4  ;;  %1321 = vst [vmem:[%s2150_s8 + $0x698] sm:$0xff] %v1320_v5 }
 0x20c   : > { %1323 = vst [vmem:[%s2150_s8 + $0x6c0] sm:$0xff] %v1322_v6  ;;  %1325 = vst [vmem:[%s2150_s8 + $0x6c8] sm:$0xff] %v1324_v7 }
 0x20d   : > { %1327 = vst [vmem:[%s2150_s8 + $0x6d0] sm:$0xff] %v1326_v8  ;;  %1329 = vst [vmem:[%s2150_s8 + $0x6d8] sm:$0xff] %v1328_v9 }
 0x20e   : > { %1331 = vst [vmem:[%s2150_s8 + $0x700] sm:$0xff] %v1330_v10  ;;  %1333 = vst [vmem:[%s2150_s8 + $0x708] sm:$0xff] %v1332_v11 }
 0x20f   : > { %1335 = vst [vmem:[%s2150_s8 + $0x710] sm:$0xff] %v1334_v12  ;;  %1337 = vst [vmem:[%s2150_s8 + $0x718] sm:$0xff] %v1336_v13 }
 0x210   : > { %1339 = vst [vmem:[%s2150_s8 + $0x740] sm:$0xff] %v1338_v14  ;;  %1341 = vst [vmem:[%s2150_s8 + $0x748] sm:$0xff] %v1340_v15 }
 0x211   : > { %1343 = vst [vmem:[%s2150_s8 + $0x750] sm:$0xff] %v1342_v16  ;;  %1345 = vst [vmem:[%s2150_s8 + $0x758] sm:$0xff] %v1344_v17 }
 0x212   : > { %1347 = vst [vmem:[%s2150_s8 + $0x780] sm:$0xff] %v1346_v18  ;;  %1349 = vst [vmem:[%s2150_s8 + $0x788] sm:$0xff] %v1348_v19 }
 0x213   : > { %1351 = vst [vmem:[%s2150_s8 + $0x790] sm:$0xff] %v1350_v20  ;;  %1353 = vst [vmem:[%s2150_s8 + $0x798] sm:$0xff] %v1352_v22 }
 0x214   : > { %1355 = vst [vmem:[%s2150_s8 + $0x7c0] sm:$0xff] %v1354_v23  ;;  %1357 = vst [vmem:[%s2150_s8 + $0x7c8] sm:$0xff] %v1356_v24 }
 0x215   : > { %1359 = vst [vmem:[%s2150_s8 + $0x7d0] sm:$0xff] %v1358_v25  ;;  %1361 = vst [vmem:[%s2150_s8 + $0x7d8] sm:$0xff] %v1360_v26 }
 0x216 PF: > { %s13_s20 = sadd.s32 1, %s1679_s20   ;;  %s2431_s12 = smov %s1651_s13 }
 0x217   : > { %p10_p1 = scmp.ge.s32.totalorder %s13_s20, 6   ;;  %s2432_s13 = smov %s1775_s4 }
 0x218   : > { %s2433_s14 = smov %s1659_s15  ;;  %s2434_s15 = smov %s1764_s27 }
 0x219   : > { %s2435_s16 = smov %s1671_s18  ;;  %s2436_s17 = smov %s1675_s19 }
 0x21a   : > { %s2437_s18 = smov %s2440_s22  ;;  %s2438_s19 = smov %s2444_s23 }
 0x21b   :  { %12 = sbr.rel (!%p10_p1) target bundleno = 5 (0x5), region = 116 }

</bundles_post_ra>
